<compile_context>
chip_gen: v6e
topology: v6e:2x2x1
jax: 0.10.0
libtpu: 0.0.40
codegen_flags: <defaults>
</compile_context>

<pallas_src>
import functools
import math

import jax
import jax.numpy as jnp
from jax import lax
from jax.experimental import pallas as pl
from jax.experimental.pallas import tpu as pltpu


# ----------------------------------------------------------------------------
# Small helpers
# ----------------------------------------------------------------------------
def _pick_tile(n, candidates):
    for c in candidates:
        if c <= n and n % c == 0:
            return c
    return n


def _pick_kv_tile(L, kw, target=512):
    """KV tile length: divides L, covers whole spatial key rows (multiple of
    kw — required to form the decomposed rel-pos bias per tile), sublane
    aligned, and <= target so the flash loop bounds per-step VMEM."""
    if L <= target:
        return L
    kh = L // kw
    best = L
    for d in range(1, kh + 1):
        t = kw * d
        if kh % d == 0 and t <= target and t % 8 == 0:
            best = t
    return best


def _head_group_size(num_heads, head_dim):
    """Smallest head count whose combined channel width is 128-lane aligned;
    falls back to all heads (full dim) when no such grouping exists."""
    g = 128 // math.gcd(head_dim, 128)
    if g > num_heads or num_heads % g != 0:
        g = num_heads
    return g


def _vmem_limit_bytes():
    """Explicit scoped-VMEM limit (defaults are only 16/32 MiB).  Leave
    headroom under physical VMEM: ~48 MiB on v7x (64 MiB physical), up to
    ~96-100 MiB on v5e/v6e (128 MiB physical)."""
    cap = 64 << 20
    try:
        cap = int(getattr(pltpu.get_tpu_info(), "vmem_capacity_bytes", cap))
    except Exception:
        pass
    return int(min(cap * 3 // 4, 100 << 20))


# ----------------------------------------------------------------------------
# Tiled linear: y = x @ W + b
# ----------------------------------------------------------------------------
def _linear_kernel(x_ref, w_ref, b_ref, o_ref):
    acc = jnp.dot(x_ref[...], w_ref[...], preferred_element_type=jnp.float32)
    o_ref[...] = (acc + b_ref[...]).astype(o_ref.dtype)


def pallas_linear(x, w, b):
    """x: (M, K), w: (K, N), b: (N,) -> (M, N). Tiled over (M, N), full K."""
    M, K = x.shape
    _, N = w.shape
    b2 = b.reshape(1, N)

    tm = _pick_tile(M, (512, 256, 128, 64, 32, 16, 8))   # prefer tm >= 256
    tn = _pick_tile(N, (512, 384, 256, 128))             # multiples of 128 else full N
    if N % tn != 0:
        tn = N

    grid = (M // tm, N // tn)
    return pl.pallas_call(
        _linear_kernel,
        out_shape=jax.ShapeDtypeStruct((M, N), x.dtype),
        grid=grid,
        in_specs=[
            pl.BlockSpec((tm, K), lambda i, j: (i, 0)),
            pl.BlockSpec((K, tn), lambda i, j: (0, j)),
            pl.BlockSpec((1, tn), lambda i, j: (0, j)),
        ],
        out_specs=pl.BlockSpec((tm, tn), lambda i, j: (i, j)),
        compiler_params=pltpu.CompilerParams(
            dimension_semantics=("parallel", "parallel"),
            vmem_limit_bytes=_vmem_limit_bytes()),
    )(x, w, b2)


# ----------------------------------------------------------------------------
# Attention core kernel: flash-style online softmax over KV tiles.
#   grid = (B, head_group, q_tile, kv_tile)        kv_tile is "arbitrary"
# ----------------------------------------------------------------------------
def _attn_kernel(*refs, g, head_dim, scale, use_rel_pos, kw, nkv, mm_dtype):
    if use_rel_pos:
        q_ref, k_ref, v_ref, rh_ref, rw_ref, o_ref, m_sc, l_sc, acc_sc = refs
    else:
        q_ref, k_ref, v_ref, o_ref, m_sc, l_sc, acc_sc = refs

    ki = pl.program_id(3)
    tq = q_ref.shape[0]
    tk = k_ref.shape[0]

    @pl.when(ki == 0)
    def _init():
        m_sc[...] = jnp.full_like(m_sc, -jnp.inf)
        l_sc[...] = jnp.zeros_like(l_sc)
        acc_sc[...] = jnp.zeros_like(acc_sc)

    # Small static unroll over the head group only (g is 2 for hd=64); the
    # per-head live ranges are bounded by the head-group grid axis.
    for hh in range(g):
        lo = hh * head_dim
        q = q_ref[:, lo:lo + head_dim] * scale                  # (tq, hd)
        k = k_ref[:, lo:lo + head_dim]                          # (tk, hd)
        if mm_dtype is not None:
            q = q.astype(mm_dtype)
            k = k.astype(mm_dtype)
        # TODO(synk): verify no XLU transpose of k is emitted for this
        # contraction; if so, feed K pre-transposed instead.
        s = lax.dot_general(q, k, (((1,), (1,)), ((), ())),
                            preferred_element_type=jnp.float32)  # (tq, tk)

        if use_rel_pos:
            tkh = tk // kw
            if nkv == 1:
                rh = rh_ref[hh]                                  # (tq, kh)
            else:
                start = pl.multiple_of(ki * tkh, tkh)
                rh = rh_ref[hh, :, pl.ds(start, tkh)]            # (tq, tkh)
            rw = rw_ref[hh]                                      # (tq, kw)
            # Lane-dense bias: expand each decomposed term to (tq, tk) first,
            # then add onto the f32 scores (full-lane-utilization adds; the
            # LxL bias is never materialized in HBM).
            rh_exp = lax.broadcast_in_dim(
                rh.astype(jnp.float32), (tq, tkh, kw), (0, 1)).reshape(tq, tk)
            rw_exp = lax.broadcast_in_dim(
                rw.astype(jnp.float32), (tq, tkh, kw), (0, 2)).reshape(tq, tk)
            s = s + rh_exp + rw_exp

        m_prev = m_sc[hh]                                        # (tq, 1)
        m_new = jnp.maximum(m_prev, jnp.max(s, axis=-1, keepdims=True))
        alpha = jnp.exp(m_prev - m_new)
        p = jnp.exp(s - m_new)                                   # (tq, tk) f32
        l_sc[hh] = alpha * l_sc[hh] + jnp.sum(p, axis=-1, keepdims=True)

        v = v_ref[:, lo:lo + head_dim]                           # (tk, hd)
        pv_dtype = mm_dtype if mm_dtype is not None else v_ref.dtype
        if mm_dtype is not None:
            v = v.astype(mm_dtype)
        acc_sc[hh] = alpha * acc_sc[hh] + jnp.dot(
            p.astype(pv_dtype), v, preferred_element_type=jnp.float32)
        m_sc[hh] = m_new

    @pl.when(ki == pl.num_programs(3) - 1)
    def _finalize():
        outs = []
        for hh in range(g):
            inv = pl.reciprocal(l_sc[hh], approx=True)           # EUP slot
            outs.append(acc_sc[hh] * inv)
        merged = outs[0] if g == 1 else jnp.concatenate(outs, axis=-1)
        o_ref[...] = merged.astype(o_ref.dtype)                  # full-width store


def _mk_q_spec(tq, gw, off):
    return pl.BlockSpec((None, tq, gw), lambda b, hp, qi, ki: (b, qi, off + hp))


def _mk_kv_spec(tk, gw, off):
    return pl.BlockSpec((None, tk, gw), lambda b, hp, qi, ki: (b, ki, off + hp))


def pallas_attention(qkv, rel_h, rel_w, num_heads, head_dim, scale, k_size,
                     mm_dtype=None):
    """qkv: (B, L, 3*dim); rel_h: (B, nH, L, kh) or None; rel_w: (B, nH, L, kw)
    or None.  Returns (B, L, dim) with heads merged along the channel axis."""
    B, L, three_dim = qkv.shape
    dim = num_heads * head_dim
    assert three_dim == 3 * dim
    use_rel_pos = rel_h is not None
    kh, kw = k_size

    g = _head_group_size(num_heads, head_dim)
    gw = g * head_dim
    n_groups = num_heads // g

    if gw % 128 == 0:
        # Narrow specs straight into the projection output (no extra copy):
        # channel block offsets select the Q / K / V regions and the head group.
        a_q = a_k = a_v = qkv
        off_q, off_k, off_v = 0, n_groups, 2 * n_groups
    else:
        # Unaligned group width (g == nH, dim not a multiple of 128): blocks
        # must span the full channel extent, so split into three views.
        a_q = qkv[:, :, :dim]
        a_k = qkv[:, :, dim:2 * dim]
        a_v = qkv[:, :, 2 * dim:]
        off_q = off_k = off_v = 0

    tq = _pick_tile(L, (256, 128, 64, 32, 16, 8))
    nq = L // tq
    tk = _pick_kv_tile(L, kw)
    nkv = L // tk

    kern = functools.partial(
        _attn_kernel, g=g, head_dim=head_dim, scale=scale,
        use_rel_pos=use_rel_pos, kw=kw, nkv=nkv, mm_dtype=mm_dtype)

    in_specs = [
        _mk_q_spec(tq, gw, off_q),
        _mk_kv_spec(tk, gw, off_k),
        _mk_kv_spec(tk, gw, off_v),
    ]
    args = [a_q, a_k, a_v]
    if use_rel_pos:
        assert rel_h.shape[-1] == kh and rel_w.shape[-1] == kw
        in_specs += [
            pl.BlockSpec((None, g, tq, kh), lambda b, hp, qi, ki: (b, hp, qi, 0)),
            pl.BlockSpec((None, g, tq, kw), lambda b, hp, qi, ki: (b, hp, qi, 0)),
        ]
        args += [rel_h, rel_w]

    return pl.pallas_call(
        kern,
        out_shape=jax.ShapeDtypeStruct((B, L, dim), qkv.dtype),
        grid=(B, n_groups, nq, nkv),
        in_specs=in_specs,
        out_specs=pl.BlockSpec((None, tq, gw), lambda b, hp, qi, ki: (b, qi, hp)),
        scratch_shapes=[
            pltpu.VMEM((g, tq, 1), jnp.float32),          # running max
            pltpu.VMEM((g, tq, 1), jnp.float32),          # running sum
            pltpu.VMEM((g, tq, head_dim), jnp.float32),   # output accumulator
        ],
        compiler_params=pltpu.CompilerParams(
            # B first so a megacore split lands on batch, not q-tiles (v7x).
            dimension_semantics=("parallel", "parallel", "parallel", "arbitrary"),
            vmem_limit_bytes=_vmem_limit_bytes()),
    )(*args)


# ----------------------------------------------------------------------------
# Relative-position helpers (tiny JAX glue: gather + small einsums)
# ----------------------------------------------------------------------------
def get_rel_pos(q_size, k_size, rel_pos):
    max_rel_dist = int(2 * max(q_size, k_size) - 1)
    assert rel_pos.shape[0] == max_rel_dist
    q_coords = jnp.arange(q_size)[:, None] * max(k_size / q_size, 1.0)
    k_coords = jnp.arange(k_size)[None, :] * max(q_size / k_size, 1.0)
    relative_coords = (q_coords - k_coords) + (k_size - 1) * max(q_size / k_size, 1.0)
    return rel_pos[relative_coords.astype(jnp.int32)]


def decomposed_rel_pos_terms(r_q, rel_pos_h, rel_pos_w, q_size, k_size):
    """r_q: (B, q_h, q_w, nH, hd) -> rel_h (B,nH,L,k_h), rel_w (B,nH,L,k_w).
    The full LxL bias is only ever formed tile-by-tile inside the kernel."""
    q_h, q_w = q_size
    k_h, k_w = k_size
    Rh = get_rel_pos(q_h, k_h, rel_pos_h)   # (q_h, k_h, hd)
    Rw = get_rel_pos(q_w, k_w, rel_pos_w)   # (q_w, k_w, hd)
    rel_h = jnp.einsum("bhwnc,hkc->bnhwk", r_q, Rh)
    rel_w = jnp.einsum("bhwnc,wkc->bnhwk", r_q, Rw)
    B, nH = rel_h.shape[0], rel_h.shape[1]
    return (rel_h.reshape(B, nH, q_h * q_w, k_h),
            rel_w.reshape(B, nH, q_h * q_w, k_w))


def decomposed_rel_pos_bias(q, rel_pos_h, rel_pos_w, q_size, k_size):
    """Reference-path helper (materializes full bias). q: (BnH, L, hd)."""
    q_h, q_w = q_size
    k_h, k_w = k_size
    Rh = get_rel_pos(q_h, k_h, rel_pos_h)
    Rw = get_rel_pos(q_w, k_w, rel_pos_w)
    BnH, _, hd = q.shape
    r_q = q.reshape(BnH, q_h, q_w, hd)
    rel_h = jnp.einsum("bhwc,hkc->bhwk", r_q, Rh)
    rel_w = jnp.einsum("bhwc,wkc->bhwk", r_q, Rw)
    bias = rel_h[:, :, :, :, None] + rel_w[:, :, :, None, :]
    return bias.reshape(BnH, q_h * q_w, k_h * k_w)


# ----------------------------------------------------------------------------
# Forward pass (Pallas-backed) and pure-JAX reference
# ----------------------------------------------------------------------------
def attention_forward(x, params, num_heads, use_rel_pos=True, mm_dtype=None):
    B, H, W, dim = x.shape
    hd = dim // num_heads
    scale = hd ** (-0.5)
    L = H * W

    qkv = pallas_linear(x.reshape(B * L, dim), params["w_qkv"], params["b_qkv"])
    qkv = qkv.reshape(B, L, 3 * dim)

    if use_rel_pos:
        r_q = qkv[:, :, :dim].reshape(B, H, W, num_heads, hd)   # unscaled q
        rel_h, rel_w = decomposed_rel_pos_terms(
            r_q, params["rel_pos_h"], params["rel_pos_w"], (H, W), (H, W))
    else:
        rel_h = rel_w = None

    o = pallas_attention(qkv, rel_h, rel_w, num_heads, hd, scale,
                         k_size=(H, W), mm_dtype=mm_dtype)
    out = pallas_linear(o.reshape(B * L, dim), params["w_proj"], params["b_proj"])
    return out.reshape(B, H, W, dim)


def attention_reference(x, params, num_heads, use_rel_pos=True):
    B, H, W, dim = x.shape
    hd = dim // num_heads
    scale = hd ** (-0.5)
    L = H * W

    qkv = x.reshape(B * L, dim) @ params["w_qkv"] + params["b_qkv"]
    qkv = qkv.reshape(B, L, 3, num_heads, hd).transpose(2, 0, 3, 1, 4)
    qkv = qkv.reshape(3, B * num_heads, L, hd)
    q, k, v = qkv[0], qkv[1], qkv[2]

    attn = (q * scale) @ jnp.swapaxes(k, -2, -1)
    if use_rel_pos:
        attn = attn + decomposed_rel_pos_bias(
            q, params["rel_pos_h"], params["rel_pos_w"], (H, W), (H, W))
    attn = jax.nn.softmax(attn, axis=-1)
    o = attn @ v
    o = o.reshape(B, num_heads, H, W, hd).transpose(0, 2, 3, 1, 4).reshape(B * L, dim)
    out = o @ params["w_proj"] + params["b_proj"]
    return out.reshape(B, H, W, dim)


# ----------------------------------------------------------------------------
# Main
# ----------------------------------------------------------------------------
if __name__ == "__main__":
    # --- Config A: SAM-like head_dim=64 -> head-pair (128-lane) grouping ----
    B, H, W = 2, 8, 8
    dim, num_heads = 128, 2
    hd = dim // num_heads

    key = jax.random.PRNGKey(0)
    ks = jax.random.split(key, 7)
    params = {
        "w_qkv": 0.05 * jax.random.normal(ks[0], (dim, 3 * dim), jnp.float32),
        "b_qkv": 0.05 * jax.random.normal(ks[1], (3 * dim,), jnp.float32),
        "w_proj": 0.05 * jax.random.normal(ks[2], (dim, dim), jnp.float32),
        "b_proj": 0.05 * jax.random.normal(ks[3], (dim,), jnp.float32),
        # rel_pos_zero_init=True would be all zeros; use small random values so
        # the rel-pos path is actually exercised.
        "rel_pos_h": 0.05 * jax.random.normal(ks[4], (2 * H - 1, hd), jnp.float32),
        "rel_pos_w": 0.05 * jax.random.normal(ks[5], (2 * W - 1, hd), jnp.float32),
    }
    x = jax.random.normal(ks[6], (B, H, W, dim), jnp.float32)

    # rel-pos path (tolerance accounts for the approximate EUP reciprocal)
    out = jax.block_until_ready(attention_forward(x, params, num_heads, use_rel_pos=True))
    ref = attention_reference(x, params, num_heads, use_rel_pos=True)
    assert out.shape == (B, H, W, dim)
    assert jnp.allclose(out, ref, atol=2e-3, rtol=2e-2), float(jnp.max(jnp.abs(out - ref)))

    # plain attention path (no rel-pos inputs passed at all)
    out2 = jax.block_until_ready(attention_forward(x, params, num_heads, use_rel_pos=False))
    ref2 = attention_reference(x, params, num_heads, use_rel_pos=False)
    assert jnp.allclose(out2, ref2, atol=2e-3, rtol=2e-2), float(jnp.max(jnp.abs(out2 - ref2)))

    # bf16 inputs -> bf16 MXU path (f32 accumulation inside the kernels)
    params_bf16 = jax.tree_util.tree_map(lambda a: a.astype(jnp.bfloat16), params)
    out_bf16 = jax.block_until_ready(
        attention_forward(x.astype(jnp.bfloat16), params_bf16, num_heads, use_rel_pos=True))
    assert out_bf16.shape == (B, H, W, dim)
    diff = jnp.abs(out_bf16.astype(jnp.float32) - ref)
    assert jnp.allclose(out_bf16.astype(jnp.float32), ref, atol=5e-2, rtol=5e-2), float(jnp.max(diff))

    # --- Config B: head_dim=8 -> full-dim group / split-qkv fallback path ---
    B2, H2, W2 = 1, 4, 4
    dim2, heads2 = 32, 4
    hd2 = dim2 // heads2
    ks2 = jax.random.split(jax.random.PRNGKey(1), 7)
    params2 = {
        "w_qkv": 0.05 * jax.random.normal(ks2[0], (dim2, 3 * dim2), jnp.float32),
        "b_qkv": 0.05 * jax.random.normal(ks2[1], (3 * dim2,), jnp.float32),
        "w_proj": 0.05 * jax.random.normal(ks2[2], (dim2, dim2), jnp.float32),
        "b_proj": 0.05 * jax.random.normal(ks2[3], (dim2,), jnp.float32),
        "rel_pos_h": 0.05 * jax.random.normal(ks2[4], (2 * H2 - 1, hd2), jnp.float32),
        "rel_pos_w": 0.05 * jax.random.normal(ks2[5], (2 * W2 - 1, hd2), jnp.float32),
    }
    x2 = jax.random.normal(ks2[6], (B2, H2, W2, dim2), jnp.float32)
    out3 = jax.block_until_ready(attention_forward(x2, params2, heads2, use_rel_pos=True))
    ref3 = attention_reference(x2, params2, heads2, use_rel_pos=True)
    assert jnp.allclose(out3, ref3, atol=2e-3, rtol=2e-2), float(jnp.max(jnp.abs(out3 - ref3)))

    print("KERNEL_OK")
</pallas_src>

<mosaic_0001>
module attributes {stable_mosaic.version = 11 : i64} {
  func.func @_linear_kernel(%arg0: i32, %arg1: i32, %arg2: memref<128x128xf32, #tpu.memory_space<vmem>>, %arg3: memref<128x384xf32, #tpu.memory_space<vmem>>, %arg4: memref<1x384xf32, #tpu.memory_space<vmem>>, %arg5: memref<128x384xf32, #tpu.memory_space<vmem>>) attributes {dimension_semantics = [#tpu.dimension_semantics<parallel>, #tpu.dimension_semantics<parallel>], iteration_bounds = array<i64: 1, 1>, scalar_prefetch = 0 : i64, scratch_operands = 0 : i64, tpu.core_type = #tpu.core_type<tc>, window_params = [{transform_indices = @transform_0, window_bounds = array<i64: 128, 128>}, {transform_indices = @transform_1, window_bounds = array<i64: 128, 384>}, {transform_indices = @transform_2, window_bounds = array<i64: 1, 384>}, {transform_indices = @transform_3, window_bounds = array<i64: 128, 384>}]} {
    %c0 = arith.constant 0 : index
    %c0_0 = arith.constant 0 : index
    %0 = vector.load %arg2[%c0, %c0_0] : memref<128x128xf32, #tpu.memory_space<vmem>>, vector<128x128xf32>
    %c0_1 = arith.constant 0 : index
    %c0_2 = arith.constant 0 : index
    %1 = vector.load %arg3[%c0_1, %c0_2] : memref<128x384xf32, #tpu.memory_space<vmem>>, vector<128x384xf32>
    %cst = arith.constant dense<0.000000e+00> : vector<128x384xf32>
    %2 = tpu.matmul %0, %1, %cst {dimension_numbers = #tpu.dot_dimension_numbers<[1], [0], [0], [1], [0, 0, 1, 1], [], []>} : vector<128x128xf32>, vector<128x384xf32>, vector<128x384xf32> -> vector<128x384xf32>
    %c0_3 = arith.constant 0 : index
    %c0_4 = arith.constant 0 : index
    %3 = vector.load %arg4[%c0_3, %c0_4] : memref<1x384xf32, #tpu.memory_space<vmem>>, vector<1x384xf32>
    %4 = vector.broadcast %3 : vector<1x384xf32> to vector<128x384xf32>
    %5 = arith.addf %2, %4 : vector<128x384xf32>
    %c0_5 = arith.constant 0 : index
    %c0_6 = arith.constant 0 : index
    %6 = vector.load %arg5[%c0_5, %c0_6] : memref<128x384xf32, #tpu.memory_space<vmem>>, vector<128x384xf32>
    tpu.vector_store %arg5[%c0_5, %c0_6], %5 {strides = array<i32>} : memref<128x384xf32, #tpu.memory_space<vmem>>, vector<128x384xf32>,
    return
  }
  func.func @transform_0(%arg0: i32, %arg1: i32) -> (i32, i32) {
    %c0_i32 = arith.constant 0 : i32
    %c0_i32_0 = arith.constant 0 : i32
    return %arg0, %c0_i32 : i32, i32
  }
  func.func @transform_1(%arg0: i32, %arg1: i32) -> (i32, i32) {
    %c0_i32 = arith.constant 0 : i32
    %c0_i32_0 = arith.constant 0 : i32
    return %c0_i32, %arg1 : i32, i32
  }
  func.func @transform_2(%arg0: i32, %arg1: i32) -> (i32, i32) {
    %c0_i32 = arith.constant 0 : i32
    %c0_i32_0 = arith.constant 0 : i32
    return %c0_i32, %arg1 : i32, i32
  }
  func.func @transform_3(%arg0: i32, %arg1: i32) -> (i32, i32) {
    %c0_i32 = arith.constant 0 : i32
    return %arg0, %arg1 : i32, i32
  }
}

</mosaic_0001>

<bundles_post_ra>
// kernel: tpu_custom_call.1
= control target key start
LH: loop header
LB: loop body
LE: loop exit
PB: predicated region body
PF: predicated region fallthrough
CT: control target
= control target key end

     0   :  { %8 = vsyncpa [#allocation3], 0  ;;  %s774_s0 = inlined_call_operand.hbm [shape: f32[128,128], index: 0, kind: input, shape index: {}]   ;;  %s775_s1 = inlined_call_operand.hbm [shape: f32[128,384], index: 1, kind: input, shape index: {}]   ;;  %s776_s2 = inlined_call_operand.vmem [shape: f32[1,384], index: 2, kind: input, shape index: {}]   ;;  %s777_s3 = inlined_call_operand.hbm [shape: f32[128,384], index: 3, kind: output, shape index: {}]  }
   0x1   :  { %9 = vsyncpa [#allocation6], 0 }
   0x2   :  { %10 = vsyncpa [#allocation4], 0  ;;  %s658_s12 = smov [#allocation2]  }
   0x3   :  { %s16_s13 = sshll.u32 %s658_s12, 4  ;;  %s17_s13 = int_to_ptr.vmem [resolvable:$true] %s16_s13 }
   0x4   :  { %s600_s14 = scalar_lea.vmem %s17_s13, 2048  ;;  %p605_p1 = scmp.lt.s32.totalorder %s17_s13, %s17_s13 }
   0x5   :  { %p601_p0 = scmp.ne.s32.totalorder %s17_s13, %s600_s14  ;;  %p606_p2 = scmp.lt.s32.totalorder %s600_s14, %s600_s14 }
   0x7   :  { %p607_p3 = por %p606_p2, %p605_p1 }
   0x9   :  { %p608_p4 = pnand %p607_p3, %p601_p0 }
   0xb   :  { %611 = shalt.err (!%p608_p4)
}
   0xc   :  { %s659_s15 = smov 128   ;;  %s660_s16 = smov 8  }
   0xd   :  { %22 = dma.hbm_to_vmem [thread:$0]  %s774_s0, 2048, %s17_s13, [#allocation3], %s659_s15, %s659_s15, %s660_s16  }
   0xe   :  { %s661_s19 = smov [#allocation5]  }
   0xf   :  { %s28_s20 = sshll.u32 %s661_s19, 4  ;;  %s29_s20 = int_to_ptr.vmem [resolvable:$true] %s28_s20 }
  0x10   :  { %s620_s21 = scalar_lea.vmem %s29_s20, 6144  ;;  %p625_p6 = scmp.lt.s32.totalorder %s29_s20, %s29_s20 }
  0x11   :  { %p621_p5 = scmp.ne.s32.totalorder %s29_s20, %s620_s21  ;;  %p626_p7 = scmp.lt.s32.totalorder %s620_s21, %s620_s21 }
  0x13   :  { %p627_p8 = por %p626_p7, %p625_p6 }
  0x15   :  { %p628_p9 = pnand %p627_p8, %p621_p5 }
  0x17   :  { %631 = shalt.err (!%p628_p9)
}
  0x18   :  { %s662_s22 = smov 384   ;;  %s663_s23 = smov 24  }
  0x19   :  { %34 = dma.hbm_to_vmem [thread:$0]  %s775_s1, 6144, %s29_s20, [#allocation6], %s662_s22, %s662_s22, %s663_s23  }
  0x1a   :  { %652 = dma.done.wait [#allocation3], 2048  }
  0x1b   :  { %653 = vsyncadd [#allocation3], 4294965248 }
  0x1c   :  { %654 = dma.done.wait [#allocation6], 6144  }
  0x1d   :  { %655 = vsyncadd [#allocation6], 4294961152  ;;  %v664_v0 = vmov 0.0   ;;  %v105_v1 = vld [vmem:[#allocation5 + $0x170] sm:$0xff]  ;;  %v104_v2 = vld [vmem:[#allocation5 + $0x168] sm:$0xff] }
  0x1e   :  { %188 = vmatprep.mubr.f32.mxu0 %v664_v0  ;;  %v102_v3 = vld [vmem:[#allocation5 + $0x158] sm:$0xff]  ;;  %124 = vmatprep.subr.mxu0 %v105_v1  ;;  %v101_v4 = vld [vmem:[#allocation5 + $0x150] sm:$0xff]  ;;  %v99_v5 = vld [vmem:[#allocation5 + $0x140] sm:$0xff] }
  0x1f   :  { %125 = vmatpush1.msra.mxu0 %v104_v2  ;;  %v98_v6 = vld [vmem:[#allocation5 + $0x138] sm:$0xff]  ;;  %v96_v7 = vld [vmem:[#allocation5 + $0x128] sm:$0xff]  ;;  %v95_v8 = vld [vmem:[#allocation5 + $0x120] sm:$0xff]  ;;  %v109_v2 = vlaneseq }
  0x20   :  { %126 = vmatprep.subr.mxu0 %v102_v3  ;;  %v93_v9 = vld [vmem:[#allocation5 + $0x110] sm:$0xff]  ;;  %v92_v10 = vld [vmem:[#allocation5 + $0x108] sm:$0xff]  ;;  %v90_v11 = vld [vmem:[#allocation5 + $0xf8] sm:$0xff] }
  0x21   :  { %127 = vmatpush1.msra.mxu0 %v101_v4  ;;  %v89_v12 = vld [vmem:[#allocation5 + $0xf0] sm:$0xff]  ;;  %v87_v13 = vld [vmem:[#allocation5 + $0xe0] sm:$0xff]  ;;  %v106_v14 = vld [vmem:[#allocation5 + $0x178] sm:$0xff]  ;;  %v110_v3 = vshrl.u32 %v109_v2, 7 }
  0x22   :  { %128 = vmatprep.subr.mxu0 %v99_v5  ;;  %v86_v15 = vld [vmem:[#allocation5 + $0xd8] sm:$0xff]  ;;  %528 = vmatprep.subr.mxu1 %v106_v14  ;;  %v103_v16 = vld [vmem:[#allocation5 + $0x160] sm:$0xff]  ;;  %v84_v17 = vld [vmem:[#allocation5 + $0xc8] sm:$0xff] }
  0x23   :  { %129 = vmatpush1.msra.mxu0 %v98_v6  ;;  %529 = vmatpush3.msra.mxu1 %v106_v14  ;;  %v100_v18 = vld [vmem:[#allocation5 + $0x148] sm:$0xff]  ;;  %v83_v19 = vld [vmem:[#allocation5 + $0xc0] sm:$0xff]  ;;  %v81_v20 = vld [vmem:[#allocation5 + $0xb0] sm:$0xff]  ;;  %v111_v4 = vsub.s32 0, %v110_v3  ;;  %v115_v6 = vsub.s32 1, %v110_v3 }
  0x24   :  { %130 = vmatprep.subr.mxu0 %v96_v7  ;;  %530 = vmatprep.subr.mxu1 %v103_v16  ;;  %v97_v21 = vld [vmem:[#allocation5 + $0x130] sm:$0xff]  ;;  %v80_v22 = vld [vmem:[#allocation5 + $0xa8] sm:$0xff]  ;;  %v78_v23 = vld [vmem:[#allocation5 + $0x98] sm:$0xff] }
  0x25   :  { %131 = vmatpush1.msra.mxu0 %v95_v8  ;;  %531 = vmatpush3.msra.mxu1 %v103_v16  ;;  %v94_v24 = vld [vmem:[#allocation5 + $0x118] sm:$0xff]  ;;  %v77_v25 = vld [vmem:[#allocation5 + $0x90] sm:$0xff]  ;;  %v75_v26 = vld [vmem:[#allocation5 + $0x80] sm:$0xff] }
  0x26   :  { %132 = vmatprep.subr.mxu0 %v93_v9  ;;  %532 = vmatprep.subr.mxu1 %v100_v18  ;;  %v91_v27 = vld [vmem:[#allocation5 + $0x100] sm:$0xff]  ;;  %v74_v28 = vld [vmem:[#allocation5 + $0x78] sm:$0xff]  ;;  %v72_v29 = vld [vmem:[#allocation5 + $0x68] sm:$0xff] }
  0x27   :  { %133 = vmatpush1.msra.mxu0 %v92_v10  ;;  %533 = vmatpush3.msra.mxu1 %v100_v18  ;;  %v88_v30 = vld [vmem:[#allocation5 + $0xe8] sm:$0xff]  ;;  %v71_v31 = vld [vmem:[#allocation5 + $0x60] sm:$0xff]  ;;  %v69_v32 = vld [vmem:[#allocation5 + $0x50] sm:$0xff] }
  0x28   :  { %134 = vmatprep.subr.mxu0 %v90_v11  ;;  %534 = vmatprep.subr.mxu1 %v97_v21  ;;  %v85_v33 = vld [vmem:[#allocation5 + $0xd0] sm:$0xff]  ;;  %v68_v34 = vld [vmem:[#allocation5 + $0x48] sm:$0xff]  ;;  %v66_v35 = vld [vmem:[#allocation5 + $0x38] sm:$0xff] }
  0x29   :  { %135 = vmatpush1.msra.mxu0 %v89_v12  ;;  %535 = vmatpush3.msra.mxu1 %v97_v21  ;;  %v82_v36 = vld [vmem:[#allocation5 + $0xb8] sm:$0xff]  ;;  %v65_v37 = vld [vmem:[#allocation5 + $0x30] sm:$0xff]  ;;  %v63_v38 = vld [vmem:[#allocation5 + $0x20] sm:$0xff]  ;;  %v119_v12 = vsub.s32 2, %v110_v3 }
  0x2a   :  { %136 = vmatprep.subr.mxu0 %v87_v13  ;;  %536 = vmatprep.subr.mxu1 %v94_v24  ;;  %v79_v39 = vld [vmem:[#allocation5 + $0xa0] sm:$0xff]  ;;  %v62_v40 = vld [vmem:[#allocation5 + $0x18] sm:$0xff]  ;;  %v60_v41 = vld [vmem:[#allocation5 + $0x8] sm:$0xff] }
  0x2b   :  { %137 = vmatpush1.msra.mxu0 %v86_v15  ;;  %537 = vmatpush3.msra.mxu1 %v94_v24  ;;  %v76_v42 = vld [vmem:[#allocation5 + $0x88] sm:$0xff]  ;;  %v59_v43 = vld [vmem:[#allocation5] sm:$0xff]  ;;  %v73_v45 = vld [vmem:[#allocation5 + $0x70] sm:$0xff] }
  0x2c   :  { %138 = vmatprep.subr.mxu0 %v84_v17  ;;  %538 = vmatprep.subr.mxu1 %v91_v27  ;;  %v43_v44 = vld [vmem:[#allocation2] sm:$0xff]  ;;  %v70_v46 = vld [vmem:[#allocation5 + $0x58] sm:$0xff]  ;;  %v44_v47 = vld [vmem:[#allocation2 + $0x8] sm:$0xff] }
  0x2d   :  { %139 = vmatpush1.msra.mxu0 %v83_v19  ;;  %539 = vmatpush3.msra.mxu1 %v91_v27  ;;  %v67_v48 = vld [vmem:[#allocation5 + $0x40] sm:$0xff]  ;;  %v64_v49 = vld [vmem:[#allocation5 + $0x28] sm:$0xff]  ;;  %v45_v50 = vld [vmem:[#allocation2 + $0x10] sm:$0xff] }
  0x2e   :  { %140 = vmatprep.subr.mxu0 %v81_v20  ;;  %540 = vmatprep.subr.mxu1 %v88_v30  ;;  %v61_v51 = vld [vmem:[#allocation5 + $0x10] sm:$0xff]  ;;  %v46_v52 = vld [vmem:[#allocation2 + $0x18] sm:$0xff]  ;;  %v47_v53 = vld [vmem:[#allocation2 + $0x20] sm:$0xff] }
  0x2f   :  { %141 = vmatpush1.msra.mxu0 %v80_v22  ;;  %541 = vmatpush3.msra.mxu1 %v88_v30  ;;  %v48_v54 = vld [vmem:[#allocation2 + $0x28] sm:$0xff]  ;;  %v49_v55 = vld [vmem:[#allocation2 + $0x30] sm:$0xff]  ;;  %v50_v56 = vld [vmem:[#allocation2 + $0x38] sm:$0xff] }
  0x30   :  { %142 = vmatprep.subr.mxu0 %v78_v23  ;;  %542 = vmatprep.subr.mxu1 %v85_v33  ;;  %v51_v57 = vld [vmem:[#allocation2 + $0x40] sm:$0xff]  ;;  %v52_v58 = vld [vmem:[#allocation2 + $0x48] sm:$0xff]  ;;  %v53_v59 = vld [vmem:[#allocation2 + $0x50] sm:$0xff] }
  0x31   :  { %143 = vmatpush1.msra.mxu0 %v77_v25  ;;  %543 = vmatpush3.msra.mxu1 %v85_v33  ;;  %v54_v60 = vld [vmem:[#allocation2 + $0x58] sm:$0xff]  ;;  %v55_v61 = vld [vmem:[#allocation2 + $0x60] sm:$0xff]  ;;  %v57_v62 = vld [vmem:[#allocation2 + $0x70] sm:$0xff] }
  0x32   :  { %144 = vmatprep.subr.mxu0 %v75_v26  ;;  %544 = vmatprep.subr.mxu1 %v82_v36  ;;  %v56_v63 = vld [vmem:[#allocation2 + $0x68] sm:$0xff]  ;;  %v58_v1 = vld [vmem:[#allocation2 + $0x78] sm:$0xff]  ;;  %v107_v5 = vld [vmem:[%s776_s2] sm:$0x7]  ;;  %s665_s2 = smov [#allocation7]  }
  0x33   :  { %145 = vmatpush1.msra.mxu0 %v74_v28  ;;  %545 = vmatpush3.msra.mxu1 %v82_v36  ;;  %v714_v7 = vrot.slane %v107_v5, %v111_v4  ;;  %v716_v8 = vrot.slane %v107_v5, %v115_v6  ;;  %v722_v17 = vrot.slane %v107_v5, %v119_v12  ;;  %s483_s26 = sshll.u32 %s665_s2, 4  ;;  %s484_s26 = int_to_ptr.vmem [resolvable:$true] %s483_s26 }
  0x34   :  { %146 = vmatprep.subr.mxu0 %v72_v29  ;;  %546 = vmatprep.subr.mxu1 %v79_v39  ;;  %s632_s27 = scalar_lea.vmem %s484_s26, 6144  ;;  %p637_p11 = scmp.lt.s32.totalorder %s484_s26, %s484_s26 }
  0x35   :  { %147 = vmatpush1.msra.mxu0 %v71_v31  ;;  %547 = vmatpush3.msra.mxu1 %v79_v39  ;;  %p633_p10 = scmp.ne.s32.totalorder %s484_s26, %s632_s27  ;;  %p638_p12 = scmp.lt.s32.totalorder %s632_s27, %s632_s27 }
  0x36   :  { %148 = vmatprep.subr.mxu0 %v69_v32  ;;  %548 = vmatprep.subr.mxu1 %v76_v42 }
  0x37   :  { %149 = vmatpush1.msra.mxu0 %v68_v34  ;;  %549 = vmatpush3.msra.mxu1 %v76_v42  ;;  %p639_p13 = por %p638_p12, %p637_p11 }
  0x38   :  { %150 = vmatprep.subr.mxu0 %v66_v35  ;;  %550 = vmatprep.subr.mxu1 %v73_v45 }
  0x39   :  { %151 = vmatpush1.msra.mxu0 %v65_v37  ;;  %551 = vmatpush3.msra.mxu1 %v73_v45  ;;  %p640_p0 = pnand %p639_p13, %p633_p10 }
  0x3a   :  { %152 = vmatprep.subr.mxu0 %v63_v38  ;;  %552 = vmatprep.subr.mxu1 %v70_v46 }
  0x3b   :  { %153 = vmatpush1.msra.mxu0 %v62_v40  ;;  %560 = vmatprep.mubr.f32.mxu1 %v43_v44 }
  0x3c   :  { %154 = vmatprep.subr.mxu0 %v60_v41  ;;  %553 = vmatpush3.msra.mxu1 %v70_v46 }
  0x3d   :  { %155 = vmatpush1.msra.mxu0 %v59_v43  ;;  %554 = vmatprep.subr.mxu1 %v67_v48 }
  0x3e   :  { %189 = vmatmul.mubr.f32.vlgmr.msra.gmra.mxu0 %v43_v44  ;;  %555 = vmatpush3.msra.mxu1 %v67_v48 }
  0x3f   :  { %194 = vmatprep.mubr.f32.mxu0 %v664_v0  ;;  %556 = vmatprep.subr.mxu1 %v64_v49 }
  0x40   :  { %557 = vmatpush3.msra.mxu1 %v64_v49 }
  0x41   :  { %558 = vmatprep.subr.mxu1 %v61_v51 }
  0x42   :  { %195 = vmatmul.mubr.f32.gmra.mxu0 %v44_v47  ;;  %559 = vmatpush3.msra.mxu1 %v61_v51 }
  0x43   :  { %200 = vmatprep.mubr.f32.mxu0 %v664_v0  ;;  %561 = vmatmul.mubr.f32.vlgmr.msra.gmra.mxu1 %v44_v47 }
  0x44   :  { %563 = vmatprep.mubr.f32.mxu1 %v45_v50 }
  0x46   :  { %201 = vmatmul.mubr.f32.gmra.mxu0 %v45_v50 }
  0x47   :  { %206 = vmatprep.mubr.f32.mxu0 %v664_v0  ;;  %564 = vmatmul.mubr.f32.gmra.mxu1 %v46_v52 }
  0x48   :  { %566 = vmatprep.mubr.f32.mxu1 %v47_v53 }
  0x4a   :  { %207 = vmatmul.mubr.f32.gmra.mxu0 %v46_v52 }
  0x4b   :  { %212 = vmatprep.mubr.f32.mxu0 %v664_v0  ;;  %567 = vmatmul.mubr.f32.gmra.mxu1 %v48_v54 }
  0x4c   :  { %569 = vmatprep.mubr.f32.mxu1 %v49_v55 }
  0x4e   :  { %213 = vmatmul.mubr.f32.gmra.mxu0 %v47_v53 }
  0x4f   :  { %218 = vmatprep.mubr.f32.mxu0 %v664_v0  ;;  %570 = vmatmul.mubr.f32.gmra.mxu1 %v50_v56 }
  0x50   :  { %572 = vmatprep.mubr.f32.mxu1 %v51_v57 }
  0x52   :  { %219 = vmatmul.mubr.f32.gmra.mxu0 %v48_v54 }
  0x53   :  { %224 = vmatprep.mubr.f32.mxu0 %v664_v0  ;;  %573 = vmatmul.mubr.f32.gmra.mxu1 %v52_v58 }
  0x54   :  { %575 = vmatprep.mubr.f32.mxu1 %v53_v59 }
  0x56   :  { %225 = vmatmul.mubr.f32.gmra.mxu0 %v49_v55 }
  0x57   :  { %230 = vmatprep.mubr.f32.mxu0 %v664_v0  ;;  %576 = vmatmul.mubr.f32.gmra.mxu1 %v54_v60 }
  0x58   :  { %578 = vmatprep.mubr.f32.mxu1 %v55_v61 }
  0x5a   :  { %231 = vmatmul.mubr.f32.gmra.mxu0 %v50_v56 }
  0x5b   :  { %236 = vmatprep.mubr.f32.mxu0 %v664_v0  ;;  %579 = vmatmul.mubr.f32.gmra.mxu1 %v56_v63 }
  0x5c   :  { %581 = vmatprep.mubr.f32.mxu1 %v57_v62 }
  0x5e   :  { %237 = vmatmul.mubr.f32.gmra.mxu0 %v51_v57 }
  0x5f   :  { %242 = vmatprep.mubr.f32.mxu0 %v664_v0  ;;  %582 = vmatmul.mubr.f32.gmra.mxu1 %v58_v1 }
  0x62   :  { %243 = vmatmul.mubr.f32.gmra.mxu0 %v52_v58 }
  0x63   :  { %248 = vmatprep.mubr.f32.mxu0 %v664_v0 }
  0x66   :  { %249 = vmatmul.mubr.f32.gmra.mxu0 %v53_v59 }
  0x67   :  { %254 = vmatprep.mubr.f32.mxu0 %v664_v0 }
  0x6a   :  { %255 = vmatmul.mubr.f32.gmra.mxu0 %v54_v60 }
  0x6b   :  { %260 = vmatprep.mubr.f32.mxu0 %v664_v0 }
  0x6e   :  { %261 = vmatmul.mubr.f32.gmra.mxu0 %v55_v61 }
  0x6f   :  { %266 = vmatprep.mubr.f32.mxu0 %v664_v0 }
  0x72   :  { %267 = vmatmul.mubr.f32.gmra.mxu0 %v56_v63 }
  0x73   :  { %272 = vmatprep.mubr.f32.mxu0 %v664_v0 }
  0x76   :  { %273 = vmatmul.mubr.f32.gmra.mxu0 %v57_v62 }
  0x77   :  { %278 = vmatprep.mubr.f32.mxu0 %v664_v0 }
  0x7a   :  { %279 = vmatmul.mubr.f32.gmra.mxu0 %v58_v1 }
  0xfe   :  { %v190_v9 = vpop.f32.mrf.mxu0 }
  0xff   :  { %v191_v10 = vadd.f32 %v190_v9, %v714_v7 }
 0x100   :  { %v192_v11 = vpop.f32.mrf.mxu0 }
 0x101   :  { %430 = vst [vmem:[#allocation7] sm:$0xff] %v191_v10  ;;  %v193_v0 = vadd.f32 %v192_v11, %v716_v8 }
 0x102   :  { %v196_v13 = vpop.f32.mrf.mxu0 }
 0x103   :  { %431 = vst [vmem:[#allocation7 + $0x8] sm:$0xff] %v193_v0  ;;  %v197_v14 = vadd.f32 %v196_v13, %v714_v7  ;;  %v562_v21 = vpop.f32.mrf.mxu1 }
 0x104   :  { %v198_v15 = vpop.f32.mrf.mxu0  ;;  %v357_v23 = vadd.f32 %v562_v21, %v722_v17 }
 0x105   :  { %433 = vst [vmem:[#allocation7 + $0x18] sm:$0xff] %v197_v14  ;;  %v199_v16 = vadd.f32 %v198_v15, %v716_v8  ;;  %v351_v25 = vpop.f32.mrf.mxu1 }
 0x106   :  { %v202_v18 = vpop.f32.mrf.mxu0  ;;  %435 = vst [vmem:[#allocation7 + $0x28] sm:$0xff] %v357_v23  ;;  %v352_v27 = vadd.f32 %v351_v25, %v722_v17 }
 0x107   :  { %434 = vst [vmem:[#allocation7 + $0x20] sm:$0xff] %v199_v16  ;;  %v203_v19 = vadd.f32 %v202_v18, %v714_v7  ;;  %v565_v29 = vpop.f32.mrf.mxu1 }
 0x108   :  { %v204_v20 = vpop.f32.mrf.mxu0  ;;  %432 = vst [vmem:[#allocation7 + $0x10] sm:$0xff] %v352_v27  ;;  %v367_v31 = vadd.f32 %v565_v29, %v722_v17 }
 0x109   :  { %436 = vst [vmem:[#allocation7 + $0x30] sm:$0xff] %v203_v19  ;;  %v205_v22 = vadd.f32 %v204_v20, %v716_v8  ;;  %v361_v33 = vpop.f32.mrf.mxu1 }
 0x10a   :  { %v208_v24 = vpop.f32.mrf.mxu0  ;;  %441 = vst [vmem:[#allocation7 + $0x58] sm:$0xff] %v367_v31  ;;  %v362_v35 = vadd.f32 %v361_v33, %v722_v17 }
 0x10b   :  { %437 = vst [vmem:[#allocation7 + $0x38] sm:$0xff] %v205_v22  ;;  %v209_v26 = vadd.f32 %v208_v24, %v714_v7  ;;  %v568_v37 = vpop.f32.mrf.mxu1 }
 0x10c   :  { %v210_v28 = vpop.f32.mrf.mxu0  ;;  %438 = vst [vmem:[#allocation7 + $0x40] sm:$0xff] %v362_v35  ;;  %v377_v39 = vadd.f32 %v568_v37, %v722_v17 }
 0x10d   :  { %439 = vst [vmem:[#allocation7 + $0x48] sm:$0xff] %v209_v26  ;;  %v211_v30 = vadd.f32 %v210_v28, %v716_v8  ;;  %v371_v41 = vpop.f32.mrf.mxu1 }
 0x10e   :  { %v214_v32 = vpop.f32.mrf.mxu0  ;;  %447 = vst [vmem:[#allocation7 + $0x88] sm:$0xff] %v377_v39  ;;  %v372_v43 = vadd.f32 %v371_v41, %v722_v17 }
 0x10f   :  { %440 = vst [vmem:[#allocation7 + $0x50] sm:$0xff] %v211_v30  ;;  %v215_v34 = vadd.f32 %v214_v32, %v714_v7  ;;  %v571_v45 = vpop.f32.mrf.mxu1 }
 0x110   :  { %v216_v36 = vpop.f32.mrf.mxu0  ;;  %444 = vst [vmem:[#allocation7 + $0x70] sm:$0xff] %v372_v43  ;;  %v387_v47 = vadd.f32 %v571_v45, %v722_v17 }
 0x111   :  { %442 = vst [vmem:[#allocation7 + $0x60] sm:$0xff] %v215_v34  ;;  %v217_v38 = vadd.f32 %v216_v36, %v716_v8  ;;  %v381_v49 = vpop.f32.mrf.mxu1 }
 0x112   :  { %v220_v40 = vpop.f32.mrf.mxu0  ;;  %453 = vst [vmem:[#allocation7 + $0xb8] sm:$0xff] %v387_v47  ;;  %v382_v51 = vadd.f32 %v381_v49, %v722_v17 }
 0x113   :  { %443 = vst [vmem:[#allocation7 + $0x68] sm:$0xff] %v217_v38  ;;  %v221_v42 = vadd.f32 %v220_v40, %v714_v7  ;;  %v574_v53 = vpop.f32.mrf.mxu1 }
 0x114   :  { %v222_v44 = vpop.f32.mrf.mxu0  ;;  %450 = vst [vmem:[#allocation7 + $0xa0] sm:$0xff] %v382_v51  ;;  %v397_v55 = vadd.f32 %v574_v53, %v722_v17 }
 0x115   :  { %445 = vst [vmem:[#allocation7 + $0x78] sm:$0xff] %v221_v42  ;;  %v223_v46 = vadd.f32 %v222_v44, %v716_v8  ;;  %v391_v57 = vpop.f32.mrf.mxu1 }
 0x116   :  { %v226_v48 = vpop.f32.mrf.mxu0  ;;  %459 = vst [vmem:[#allocation7 + $0xe8] sm:$0xff] %v397_v55  ;;  %v392_v59 = vadd.f32 %v391_v57, %v722_v17 }
 0x117   :  { %446 = vst [vmem:[#allocation7 + $0x80] sm:$0xff] %v223_v46  ;;  %v227_v50 = vadd.f32 %v226_v48, %v714_v7  ;;  %v577_v61 = vpop.f32.mrf.mxu1 }
 0x118   :  { %v228_v52 = vpop.f32.mrf.mxu0  ;;  %456 = vst [vmem:[#allocation7 + $0xd0] sm:$0xff] %v392_v59  ;;  %v407_v63 = vadd.f32 %v577_v61, %v722_v17 }
 0x119   :  { %448 = vst [vmem:[#allocation7 + $0x90] sm:$0xff] %v227_v50  ;;  %v229_v54 = vadd.f32 %v228_v52, %v716_v8  ;;  %v401_v2 = vpop.f32.mrf.mxu1 }
 0x11a   :  { %v232_v56 = vpop.f32.mrf.mxu0  ;;  %465 = vst [vmem:[#allocation7 + $0x118] sm:$0xff] %v407_v63  ;;  %v402_v4 = vadd.f32 %v401_v2, %v722_v17 }
 0x11b   :  { %449 = vst [vmem:[#allocation7 + $0x98] sm:$0xff] %v229_v54  ;;  %v233_v58 = vadd.f32 %v232_v56, %v714_v7  ;;  %v580_v6 = vpop.f32.mrf.mxu1 }
 0x11c   :  { %v234_v60 = vpop.f32.mrf.mxu0  ;;  %462 = vst [vmem:[#allocation7 + $0x100] sm:$0xff] %v402_v4  ;;  %v417_v10 = vadd.f32 %v580_v6, %v722_v17 }
 0x11d   :  { %451 = vst [vmem:[#allocation7 + $0xa8] sm:$0xff] %v233_v58  ;;  %v235_v62 = vadd.f32 %v234_v60, %v716_v8  ;;  %v411_v0 = vpop.f32.mrf.mxu1 }
 0x11e   :  { %v238_v1 = vpop.f32.mrf.mxu0  ;;  %471 = vst [vmem:[#allocation7 + $0x148] sm:$0xff] %v417_v10  ;;  %v412_v13 = vadd.f32 %v411_v0, %v722_v17 }
 0x11f   :  { %452 = vst [vmem:[#allocation7 + $0xb0] sm:$0xff] %v235_v62  ;;  %v239_v3 = vadd.f32 %v238_v1, %v714_v7  ;;  %v583_v15 = vpop.f32.mrf.mxu1 }
 0x120   :  { %v240_v5 = vpop.f32.mrf.mxu0  ;;  %468 = vst [vmem:[#allocation7 + $0x130] sm:$0xff] %v412_v13  ;;  %v427_v18 = vadd.f32 %v583_v15, %v722_v17 }
 0x121   :  { %454 = vst [vmem:[#allocation7 + $0xc0] sm:$0xff] %v239_v3  ;;  %v241_v9 = vadd.f32 %v240_v5, %v716_v8  ;;  %v421_v20 = vpop.f32.mrf.mxu1 }
 0x122   :  { %v244_v11 = vpop.f32.mrf.mxu0  ;;  %477 = vst [vmem:[#allocation7 + $0x178] sm:$0xff] %v427_v18  ;;  %v422_v22 = vadd.f32 %v421_v20, %v722_v17 }
 0x123   :  { %455 = vst [vmem:[#allocation7 + $0xc8] sm:$0xff] %v241_v9  ;;  %v245_v12 = vadd.f32 %v244_v11, %v714_v7 }
 0x124   :  { %v246_v14 = vpop.f32.mrf.mxu0  ;;  %474 = vst [vmem:[#allocation7 + $0x160] sm:$0xff] %v422_v22 }
 0x125   :  { %457 = vst [vmem:[#allocation7 + $0xd8] sm:$0xff] %v245_v12  ;;  %v247_v16 = vadd.f32 %v246_v14, %v716_v8 }
 0x126   :  { %v250_v19 = vpop.f32.mrf.mxu0 }
 0x127   :  { %458 = vst [vmem:[#allocation7 + $0xe0] sm:$0xff] %v247_v16  ;;  %v251_v21 = vadd.f32 %v250_v19, %v714_v7 }
 0x128   :  { %v252_v23 = vpop.f32.mrf.mxu0 }
 0x129   :  { %460 = vst [vmem:[#allocation7 + $0xf0] sm:$0xff] %v251_v21  ;;  %v253_v24 = vadd.f32 %v252_v23, %v716_v8 }
 0x12a   :  { %v256_v25 = vpop.f32.mrf.mxu0 }
 0x12b   :  { %461 = vst [vmem:[#allocation7 + $0xf8] sm:$0xff] %v253_v24  ;;  %v257_v26 = vadd.f32 %v256_v25, %v714_v7 }
 0x12c   :  { %v258_v27 = vpop.f32.mrf.mxu0 }
 0x12d   :  { %463 = vst [vmem:[#allocation7 + $0x108] sm:$0xff] %v257_v26  ;;  %v259_v28 = vadd.f32 %v258_v27, %v716_v8 }
 0x12e   :  { %v262_v29 = vpop.f32.mrf.mxu0 }
 0x12f   :  { %464 = vst [vmem:[#allocation7 + $0x110] sm:$0xff] %v259_v28  ;;  %v263_v30 = vadd.f32 %v262_v29, %v714_v7 }
 0x130   :  { %v264_v31 = vpop.f32.mrf.mxu0 }
 0x131   :  { %466 = vst [vmem:[#allocation7 + $0x120] sm:$0xff] %v263_v30  ;;  %v265_v17 = vadd.f32 %v264_v31, %v716_v8 }
 0x132   :  { %v268_v32 = vpop.f32.mrf.mxu0 }
 0x133   :  { %467 = vst [vmem:[#allocation7 + $0x128] sm:$0xff] %v265_v17  ;;  %v269_v33 = vadd.f32 %v268_v32, %v714_v7 }
 0x134   :  { %v270_v34 = vpop.f32.mrf.mxu0 }
 0x135   :  { %469 = vst [vmem:[#allocation7 + $0x138] sm:$0xff] %v269_v33  ;;  %v271_v35 = vadd.f32 %v270_v34, %v716_v8 }
 0x136   :  { %v274_v36 = vpop.f32.mrf.mxu0 }
 0x137   :  { %470 = vst [vmem:[#allocation7 + $0x140] sm:$0xff] %v271_v35  ;;  %v275_v37 = vadd.f32 %v274_v36, %v714_v7 }
 0x138   :  { %v276_v38 = vpop.f32.mrf.mxu0 }
 0x139   :  { %472 = vst [vmem:[#allocation7 + $0x150] sm:$0xff] %v275_v37  ;;  %v277_v39 = vadd.f32 %v276_v38, %v716_v8 }
 0x13a   :  { %v280_v40 = vpop.f32.mrf.mxu0 }
 0x13b   :  { %473 = vst [vmem:[#allocation7 + $0x158] sm:$0xff] %v277_v39  ;;  %v281_v41 = vadd.f32 %v280_v40, %v714_v7 }
 0x13c   :  { %v282_v42 = vpop.f32.mrf.mxu0 }
 0x13d   :  { %475 = vst [vmem:[#allocation7 + $0x168] sm:$0xff] %v281_v41  ;;  %v283_v43 = vadd.f32 %v282_v42, %v716_v8 }
 0x13f   :  { %476 = vst [vmem:[#allocation7 + $0x170] sm:$0xff] %v283_v43 }
 0x140   :  { %643 = shalt.err (!%p640_p0)
}
 0x141   :  { %489 = dma.vmem_to_hbm [thread:$0]  %s484_s26, 6144, %s777_s3, [#allocation4], %s662_s22, %s662_s22, %s663_s23  }
 0x142   :  { %656 = dma.done.wait [#allocation4], 6144  }
 0x143   :  { %657 = vsyncadd [#allocation4], 4294961152 }
 0x144   :  { %493 = vsyncpa [#allocation3], 1 }
 0x145   :  { %494 = vsyncpa [#allocation6], 1 }
 0x146   :  { %495 = vsyncpa [#allocation4], 1 }

</bundles_post_ra>
